<compile_context>
chip_gen: v6e
topology: v6e:2x2x1
jax: 0.10.0
libtpu: 0.0.40
codegen_flags: <defaults>
</compile_context>

<pallas_src>
import functools

import jax
import jax.numpy as jnp
from jax.experimental import pallas as pl
from jax.experimental.pallas import tpu as pltpu


def _lowest_value(dtype):
    """Identity element for max in `dtype` (masked-out lanes)."""
    dtype = jnp.dtype(dtype)
    if jnp.issubdtype(dtype, jnp.floating):
        return jnp.array(-jnp.inf, dtype)
    return jnp.array(jnp.iinfo(dtype).min, dtype)


def _vmem_capacity_bytes() -> int:
    """Physical VMEM of the local TPU; conservative (v7x-sized) fallback."""
    try:
        cap = getattr(pltpu.get_tpu_info(), "vmem_capacity_bytes", None)
        if cap:
            return int(cap)
    except Exception:
        pass
    return 64 * 1024 * 1024


def _num_tensorcores() -> int:
    """TensorCores one kernel can shard a 'parallel' grid axis across.

    v5e / v6e expose a single TensorCore per chip; v4 / v5p (megacore) and
    v7x expose two.
    """
    try:
        kind = jax.devices()[0].device_kind.lower()
    except Exception:
        return 1
    if any(s in kind for s in ("v5e", "v5 lite", "v5lite",
                               "v6e", "v6 lite", "v6lite")):
        return 1
    if any(s in kind for s in ("v4", "v5p", "v7", "7x")):
        return 2
    return 1


def _pick_tb(rows, lanes, itemsize_both, *, vmem_limit_bytes, sub):
    """Largest row tile (multiple of `sub`) whose VMEM footprint fits.

    Footprint model: the class axis pads to a 128-lane multiple; the pipeline
    double-buffers both inputs (4 tile-equivalents) and the body keeps a
    handful of tile-sized temporaries (iota / masks / where results) live, so
    we budget ~10 single-tile equivalents (= 5 "both-input" rows) against
    ~75% of the scoped VMEM limit.
    """
    lanes_padded = ((lanes + 127) // 128) * 128
    bytes_per_row_both = lanes_padded * max(1, itemsize_both)
    budget = int(vmem_limit_bytes * 0.75)
    tb = budget // (5 * bytes_per_row_both)
    tb = max(sub, (tb // sub) * sub)
    return rows if tb >= rows else tb


def _squared_accuracy_kernel(in_ref, tgt_ref, out_ref, *,
                             rows_total, tb, seg, nseg,
                             steps_per_part, needs_mask):
    # in_ref / tgt_ref: (tb, nseg*seg) tiles, native dtype (no upcast — max &
    #   compare in-kind preserves the first-occurrence tie-break).
    # out_ref: (1, 8, 128) f32 lane-dense block, resident across the
    #   reduction axis; every element holds the partition's running count.
    p = pl.program_id(0)   # partition ("parallel" / megacore) axis
    i = pl.program_id(1)   # reduction ("arbitrary") axis within a partition

    @pl.when(i == 0)
    def _():
        out_ref[...] = jnp.zeros(out_ref.shape, out_ref.dtype)

    x = in_ref[...]                       # (tb, L)
    t = tgt_ref[...]                      # (tb, L)
    L = x.shape[1]                        # = nseg * seg

    col = jax.lax.broadcasted_iota(jnp.int32, (tb, L), 1)
    big = jnp.int32(L)                    # "no max found" sentinel
    fill_x = _lowest_value(x.dtype)
    fill_t = _lowest_value(t.dtype)

    if needs_mask:
        # Mask rows of partial edge blocks / duplicated clamp blocks.
        lin = p * steps_per_part + i      # unclamped linear block id
        rows = lin * tb + jax.lax.broadcasted_iota(jnp.int32, (tb, 1), 0)
        row_ok = rows < rows_total
    else:
        row_ok = None

    cnt = jnp.float32(0.0)
    for m in range(nseg):                 # static unroll over packed segments
        if nseg == 1:
            x_max = jnp.max(x, axis=1, keepdims=True)
            arg_x = jnp.min(jnp.where(x == x_max, col, big),
                            axis=1, keepdims=True)
            t_max = jnp.max(t, axis=1, keepdims=True)
            arg_t = jnp.min(jnp.where(t == t_max, col, big),
                            axis=1, keepdims=True)
        else:
            lane_ok = jnp.logical_and(col >= m * seg, col < (m + 1) * seg)
            x_max = jnp.max(jnp.where(lane_ok, x, fill_x),
                            axis=1, keepdims=True)
            arg_x = jnp.min(
                jnp.where(jnp.logical_and(lane_ok, x == x_max), col, big),
                axis=1, keepdims=True)
            t_max = jnp.max(jnp.where(lane_ok, t, fill_t),
                            axis=1, keepdims=True)
            arg_t = jnp.min(
                jnp.where(jnp.logical_and(lane_ok, t == t_max), col, big),
                axis=1, keepdims=True)
        match = arg_x == arg_t                            # (tb, 1) bool
        if row_ok is not None:
            match = jnp.logical_and(match, row_ok)
        cnt = cnt + jnp.sum(match.astype(jnp.float32))

    out_ref[...] += cnt                   # scalar broadcast-add into block


def squared_accuracy(inputs: jax.Array, targets: jax.Array, *,
                     tb: int | None = None,
                     num_parts: int | None = None) -> jax.Array:
    """Pallas equivalent of SquaredAccuracy.forward. Returns a scalar f32."""
    assert inputs.shape == targets.shape and inputs.ndim == 2
    B, C = inputs.shape
    isz_x = jnp.dtype(inputs.dtype).itemsize
    isz_t = jnp.dtype(targets.dtype).itemsize
    # Dtype-aware sublane rounding: 8 for 4-byte, 16 for 2-byte, 32 for 1-byte.
    sub = max(8, 32 // max(1, min(isz_x, isz_t)))

    # Lane packing for narrow class axes: fold k = 128 // C rows into one
    # 128-lane row (free contiguous reshape in HBM) to kill lane padding.
    k = 1
    if 8 <= C < 128 and 128 % C == 0 and B % (128 // C) == 0:
        k = 128 // C
    if k > 1:
        x_arr = inputs.reshape(B // k, k * C)
        t_arr = targets.reshape(B // k, k * C)
    else:
        x_arr, t_arr = inputs, targets
    rows_total, L = x_arr.shape

    phys_vmem = _vmem_capacity_bytes()
    vmem_limit = (phys_vmem * 3) // 4          # ~96 MiB v5e/v6e, ~48 MiB v7x

    if tb is None:
        tb = _pick_tb(rows_total, L, isz_x + isz_t,
                      vmem_limit_bytes=vmem_limit, sub=sub)
    else:
        tb = min(int(tb), rows_total)
        if tb < rows_total:
            tb = max(sub, (tb // sub) * sub)
            tb = min(tb, rows_total)

    # Wide-C guard: if even this tile overruns the scoped budget, raise the
    # limit toward physical VMEM instead of failing the compile outright.
    lanes_padded = ((L + 127) // 128) * 128
    needed_limit = int(5 * tb * lanes_padded * (isz_x + isz_t) / 0.75) + (1 << 20)
    if needed_limit > vmem_limit:
        vmem_limit = min(max(vmem_limit, needed_limit), phys_vmem - (4 << 20))

    if num_parts is None:
        num_parts = _num_tensorcores()

    total_blocks = pl.cdiv(rows_total, tb)
    num_parts = max(1, min(int(num_parts), total_blocks))
    steps_per_part = pl.cdiv(total_blocks, num_parts)
    exact = num_parts * steps_per_part == total_blocks
    needs_mask = (rows_total % tb != 0) or (not exact)

    if exact:
        def in_map(p, i):
            return (p * steps_per_part + i, 0)
    else:
        def in_map(p, i):
            # Clamp so duplicated tail steps re-read the last in-bounds block;
            # their rows are masked out inside the kernel.
            return (jnp.minimum(p * steps_per_part + i, total_blocks - 1), 0)

    kernel = functools.partial(
        _squared_accuracy_kernel,
        rows_total=rows_total, tb=tb, seg=C, nseg=k,
        steps_per_part=steps_per_part, needs_mask=needs_mask)

    out = pl.pallas_call(
        kernel,
        out_shape=jax.ShapeDtypeStruct((num_parts, 8, 128), jnp.float32),
        grid_spec=pltpu.PrefetchScalarGridSpec(
            num_scalar_prefetch=0,
            grid=(num_parts, steps_per_part),
            in_specs=[
                pl.BlockSpec((tb, L), in_map),
                pl.BlockSpec((tb, L), in_map),
            ],
            out_specs=pl.BlockSpec((1, 8, 128), lambda p, i: (p, 0, 0)),
        ),
        compiler_params=pltpu.CompilerParams(
            # TODO(synk): confirm via the Mosaic dump / xprof that the leading
            # "parallel" axis really shards across both v7x TensorCores; if
            # not, switch to pltpu.CORE_PARALLEL or an explicit core_map (the
            # per-partition partial-output pattern already supports it).
            dimension_semantics=("parallel", "arbitrary"),
            vmem_limit_bytes=int(vmem_limit),
        ),
    )(x_arr, t_arr)

    # Per-partition partial counts live at [:, 0, 0]; sum in the wrapper.
    return jnp.sum(out[:, 0, 0])


if __name__ == "__main__":
    key = jax.random.PRNGKey(0)
    k1, k2, k3, k4, k5, k6 = jax.random.split(key, 6)

    # Case 1: lane-packed path (C=32 -> 4 rows per 128-lane row), single block.
    B1, C1 = 16, 32
    x1 = jax.random.normal(k1, (B1, C1), dtype=jnp.float32)
    y1 = jax.nn.one_hot(jax.random.randint(k2, (B1,), 0, C1), C1,
                        dtype=jnp.float32)
    r1 = jax.block_until_ready(squared_accuracy(x1, y1))
    ref1 = jnp.sum((jnp.argmax(x1, 1) == jnp.argmax(y1, 1)).astype(jnp.float32))
    assert jnp.allclose(r1, ref1), (r1, ref1)

    # Case 2: unpacked path (C=33), ragged batch + forced small tile to
    # exercise the clamp/row-mask logic.
    B2, C2 = 13, 33
    x2 = jax.random.normal(k3, (B2, C2), dtype=jnp.float32)
    y2 = jax.nn.one_hot(jax.random.randint(k4, (B2,), 0, C2), C2,
                        dtype=jnp.float32)
    r2 = jax.block_until_ready(squared_accuracy(x2, y2, tb=8))
    ref2 = jnp.sum((jnp.argmax(x2, 1) == jnp.argmax(y2, 1)).astype(jnp.float32))
    assert jnp.allclose(r2, ref2), (r2, ref2)

    # Case 3: packed path (C=16 -> k=8, 9 packed rows) with 2 blocks and a
    # partial edge block.
    B3, C3 = 72, 16
    x3 = jax.random.normal(k5, (B3, C3), dtype=jnp.float32)
    y3 = jax.nn.one_hot(jax.random.randint(k6, (B3,), 0, C3), C3,
                        dtype=jnp.float32)
    r3 = jax.block_until_ready(squared_accuracy(x3, y3, tb=8))
    ref3 = jnp.sum((jnp.argmax(x3, 1) == jnp.argmax(y3, 1)).astype(jnp.float32))
    assert jnp.allclose(r3, ref3), (r3, ref3)

    print("KERNEL_OK")
</pallas_src>

<mosaic_0001>
module attributes {stable_mosaic.version = 11 : i64} {
  func.func @_squared_accuracy_kernel(%arg0: i32, %arg1: i32, %arg2: memref<4x128xf32, #tpu.memory_space<vmem>>, %arg3: memref<4x128xf32, #tpu.memory_space<vmem>>, %arg4: memref<1x8x128xf32, #tpu.memory_space<vmem>>) attributes {dimension_semantics = [#tpu.dimension_semantics<parallel>, #tpu.dimension_semantics<arbitrary>], iteration_bounds = array<i64: 1, 1>, scalar_prefetch = 0 : i64, scratch_operands = 0 : i64, tpu.core_type = #tpu.core_type<tc>, window_params = [{transform_indices = @transform_0, window_bounds = array<i64: 4, 128>}, {transform_indices = @transform_1, window_bounds = array<i64: 4, 128>}, {transform_indices = @transform_2, window_bounds = array<i64: 1, 8, 128>}]} {
    %c0_i32 = arith.constant 0 : i32
    %0 = arith.cmpi eq, %arg1, %c0_i32 : i32
    %1 = arith.extui %0 : i1 to i32
    %c0_i32_0 = arith.constant 0 : i32
    %2 = arith.cmpi ne, %1, %c0_i32_0 : i32
    scf.if %2 {
      %cst_50 = arith.constant 0.000000e+00 : f32
      %150 = vector.broadcast %cst_50 : f32 to vector<1x8x128xf32>
      %c0_51 = arith.constant 0 : index
      %c0_52 = arith.constant 0 : index
      %c0_53 = arith.constant 0 : index
      %151 = vector.load %arg4[%c0_51, %c0_52, %c0_53] : memref<1x8x128xf32, #tpu.memory_space<vmem>>, vector<1x8x128xf32>
      tpu.vector_store %arg4[%c0_51, %c0_52, %c0_53], %150 {strides = array<i32>} : memref<1x8x128xf32, #tpu.memory_space<vmem>>, vector<1x8x128xf32>,
    } else {
    }
    %c0 = arith.constant 0 : index
    %c0_1 = arith.constant 0 : index
    %3 = vector.load %arg2[%c0, %c0_1] : memref<4x128xf32, #tpu.memory_space<vmem>>, vector<4x128xf32>
    %c0_2 = arith.constant 0 : index
    %c0_3 = arith.constant 0 : index
    %4 = vector.load %arg3[%c0_2, %c0_3] : memref<4x128xf32, #tpu.memory_space<vmem>>, vector<4x128xf32>
    %5 = tpu.iota {dimensions = array<i32: 1>} : vector<4x128xi32>
    %c0_i32_4 = arith.constant 0 : i32
    %6 = vector.broadcast %c0_i32_4 : i32 to vector<4x128xi32>
    %7 = arith.cmpi sge, %5, %6 : vector<4x128xi32>
    %c32_i32 = arith.constant 32 : i32
    %8 = vector.broadcast %c32_i32 : i32 to vector<4x128xi32>
    %9 = arith.cmpi slt, %5, %8 : vector<4x128xi32>
    %10 = arith.andi %7, %9 : vector<4x128xi1>
    %cst = arith.constant 0xFF800000 : f32
    %11 = vector.broadcast %cst : f32 to vector<4x128xf32>
    %12 = arith.select %10, %3, %11 : vector<4x128xi1>, vector<4x128xf32>
    %cst_5 = arith.constant dense<0xFF800000> : vector<4xf32>
    %13 = vector.multi_reduction <maximumf>, %12, %cst_5 [1] : vector<4x128xf32> to vector<4xf32>
    %14 = vector.shape_cast %13 : vector<4xf32> to vector<4x1xf32>
    %15 = vector.broadcast %14 : vector<4x1xf32> to vector<4x128xf32>
    %16 = arith.cmpf oeq, %3, %15 : vector<4x128xf32>
    %17 = arith.andi %10, %16 : vector<4x128xi1>
    %c128_i32 = arith.constant 128 : i32
    %18 = vector.broadcast %c128_i32 : i32 to vector<4x128xi32>
    %19 = arith.select %17, %5, %18 : vector<4x128xi1>, vector<4x128xi32>
    %cst_6 = arith.constant dense<2147483647> : vector<4xi32>
    %20 = vector.multi_reduction <minsi>, %19, %cst_6 [1] : vector<4x128xi32> to vector<4xi32>
    %21 = vector.shape_cast %20 : vector<4xi32> to vector<4x1xi32>
    %cst_7 = arith.constant 0xFF800000 : f32
    %22 = vector.broadcast %cst_7 : f32 to vector<4x128xf32>
    %23 = arith.select %10, %4, %22 : vector<4x128xi1>, vector<4x128xf32>
    %cst_8 = arith.constant dense<0xFF800000> : vector<4xf32>
    %24 = vector.multi_reduction <maximumf>, %23, %cst_8 [1] : vector<4x128xf32> to vector<4xf32>
    %25 = vector.shape_cast %24 : vector<4xf32> to vector<4x1xf32>
    %26 = vector.broadcast %25 : vector<4x1xf32> to vector<4x128xf32>
    %27 = arith.cmpf oeq, %4, %26 : vector<4x128xf32>
    %28 = arith.andi %10, %27 : vector<4x128xi1>
    %c128_i32_9 = arith.constant 128 : i32
    %29 = vector.broadcast %c128_i32_9 : i32 to vector<4x128xi32>
    %30 = arith.select %28, %5, %29 : vector<4x128xi1>, vector<4x128xi32>
    %cst_10 = arith.constant dense<2147483647> : vector<4xi32>
    %31 = vector.multi_reduction <minsi>, %30, %cst_10 [1] : vector<4x128xi32> to vector<4xi32>
    %32 = vector.shape_cast %31 : vector<4xi32> to vector<4x1xi32>
    %33 = arith.cmpi eq, %21, %32 : vector<4x1xi32>
    %34 = arith.extui %33 : vector<4x1xi1> to vector<4x1xi32>
    %35 = arith.sitofp %34 : vector<4x1xi32> to vector<4x1xf32>
    %36 = vector.shape_cast %35 : vector<4x1xf32> to vector<1x4x1xf32>
    %cst_11 = arith.constant dense<0.000000e+00> : vector<1xf32>
    %37 = vector.multi_reduction <add>, %36, %cst_11 [1, 2] : vector<1x4x1xf32> to vector<1xf32>
    %38 = vector.shape_cast %37 : vector<1xf32> to vector<1x1x1xf32>
    %39 = vector.extract %38[0, 0, 0] : f32 from vector<1x1x1xf32>
    %cst_12 = arith.constant 0.000000e+00 : f32
    %40 = arith.addf %cst_12, %39 : f32
    %c32_i32_13 = arith.constant 32 : i32
    %41 = vector.broadcast %c32_i32_13 : i32 to vector<4x128xi32>
    %42 = arith.cmpi sge, %5, %41 : vector<4x128xi32>
    %c64_i32 = arith.constant 64 : i32
    %43 = vector.broadcast %c64_i32 : i32 to vector<4x128xi32>
    %44 = arith.cmpi slt, %5, %43 : vector<4x128xi32>
    %45 = arith.andi %42, %44 : vector<4x128xi1>
    %cst_14 = arith.constant 0xFF800000 : f32
    %46 = vector.broadcast %cst_14 : f32 to vector<4x128xf32>
    %47 = arith.select %45, %3, %46 : vector<4x128xi1>, vector<4x128xf32>
    %cst_15 = arith.constant dense<0xFF800000> : vector<4xf32>
    %48 = vector.multi_reduction <maximumf>, %47, %cst_15 [1] : vector<4x128xf32> to vector<4xf32>
    %49 = vector.shape_cast %48 : vector<4xf32> to vector<4x1xf32>
    %50 = vector.broadcast %49 : vector<4x1xf32> to vector<4x128xf32>
    %51 = arith.cmpf oeq, %3, %50 : vector<4x128xf32>
    %52 = arith.andi %45, %51 : vector<4x128xi1>
    %c128_i32_16 = arith.constant 128 : i32
    %53 = vector.broadcast %c128_i32_16 : i32 to vector<4x128xi32>
    %54 = arith.select %52, %5, %53 : vector<4x128xi1>, vector<4x128xi32>
    %cst_17 = arith.constant dense<2147483647> : vector<4xi32>
    %55 = vector.multi_reduction <minsi>, %54, %cst_17 [1] : vector<4x128xi32> to vector<4xi32>
    %56 = vector.shape_cast %55 : vector<4xi32> to vector<4x1xi32>
    %cst_18 = arith.constant 0xFF800000 : f32
    %57 = vector.broadcast %cst_18 : f32 to vector<4x128xf32>
    %58 = arith.select %45, %4, %57 : vector<4x128xi1>, vector<4x128xf32>
    %cst_19 = arith.constant dense<0xFF800000> : vector<4xf32>
    %59 = vector.multi_reduction <maximumf>, %58, %cst_19 [1] : vector<4x128xf32> to vector<4xf32>
    %60 = vector.shape_cast %59 : vector<4xf32> to vector<4x1xf32>
    %61 = vector.broadcast %60 : vector<4x1xf32> to vector<4x128xf32>
    %62 = arith.cmpf oeq, %4, %61 : vector<4x128xf32>
    %63 = arith.andi %45, %62 : vector<4x128xi1>
    %c128_i32_20 = arith.constant 128 : i32
    %64 = vector.broadcast %c128_i32_20 : i32 to vector<4x128xi32>
    %65 = arith.select %63, %5, %64 : vector<4x128xi1>, vector<4x128xi32>
    %cst_21 = arith.constant dense<2147483647> : vector<4xi32>
    %66 = vector.multi_reduction <minsi>, %65, %cst_21 [1] : vector<4x128xi32> to vector<4xi32>
    %67 = vector.shape_cast %66 : vector<4xi32> to vector<4x1xi32>
    %68 = arith.cmpi eq, %56, %67 : vector<4x1xi32>
    %69 = arith.extui %68 : vector<4x1xi1> to vector<4x1xi32>
    %70 = arith.sitofp %69 : vector<4x1xi32> to vector<4x1xf32>
    %71 = vector.shape_cast %70 : vector<4x1xf32> to vector<1x4x1xf32>
    %cst_22 = arith.constant dense<0.000000e+00> : vector<1xf32>
    %72 = vector.multi_reduction <add>, %71, %cst_22 [1, 2] : vector<1x4x1xf32> to vector<1xf32>
    %73 = vector.shape_cast %72 : vector<1xf32> to vector<1x1x1xf32>
    %74 = vector.extract %73[0, 0, 0] : f32 from vector<1x1x1xf32>
    %75 = arith.addf %40, %74 : f32
    %c64_i32_23 = arith.constant 64 : i32
    %76 = vector.broadcast %c64_i32_23 : i32 to vector<4x128xi32>
    %77 = arith.cmpi sge, %5, %76 : vector<4x128xi32>
    %c96_i32 = arith.constant 96 : i32
    %78 = vector.broadcast %c96_i32 : i32 to vector<4x128xi32>
    %79 = arith.cmpi slt, %5, %78 : vector<4x128xi32>
    %80 = arith.andi %77, %79 : vector<4x128xi1>
    %cst_24 = arith.constant 0xFF800000 : f32
    %81 = vector.broadcast %cst_24 : f32 to vector<4x128xf32>
    %82 = arith.select %80, %3, %81 : vector<4x128xi1>, vector<4x128xf32>
    %cst_25 = arith.constant dense<0xFF800000> : vector<4xf32>
    %83 = vector.multi_reduction <maximumf>, %82, %cst_25 [1] : vector<4x128xf32> to vector<4xf32>
    %84 = vector.shape_cast %83 : vector<4xf32> to vector<4x1xf32>
    %85 = vector.broadcast %84 : vector<4x1xf32> to vector<4x128xf32>
    %86 = arith.cmpf oeq, %3, %85 : vector<4x128xf32>
    %87 = arith.andi %80, %86 : vector<4x128xi1>
    %c128_i32_26 = arith.constant 128 : i32
    %88 = vector.broadcast %c128_i32_26 : i32 to vector<4x128xi32>
    %89 = arith.select %87, %5, %88 : vector<4x128xi1>, vector<4x128xi32>
    %cst_27 = arith.constant dense<2147483647> : vector<4xi32>
    %90 = vector.multi_reduction <minsi>, %89, %cst_27 [1] : vector<4x128xi32> to vector<4xi32>
    %91 = vector.shape_cast %90 : vector<4xi32> to vector<4x1xi32>
    %cst_28 = arith.constant 0xFF800000 : f32
    %92 = vector.broadcast %cst_28 : f32 to vector<4x128xf32>
    %93 = arith.select %80, %4, %92 : vector<4x128xi1>, vector<4x128xf32>
    %cst_29 = arith.constant dense<0xFF800000> : vector<4xf32>
    %94 = vector.multi_reduction <maximumf>, %93, %cst_29 [1] : vector<4x128xf32> to vector<4xf32>
    %95 = vector.shape_cast %94 : vector<4xf32> to vector<4x1xf32>
    %96 = vector.broadcast %95 : vector<4x1xf32> to vector<4x128xf32>
    %97 = arith.cmpf oeq, %4, %96 : vector<4x128xf32>
    %98 = arith.andi %80, %97 : vector<4x128xi1>
    %c128_i32_30 = arith.constant 128 : i32
    %99 = vector.broadcast %c128_i32_30 : i32 to vector<4x128xi32>
    %100 = arith.select %98, %5, %99 : vector<4x128xi1>, vector<4x128xi32>
    %cst_31 = arith.constant dense<2147483647> : vector<4xi32>
    %101 = vector.multi_reduction <minsi>, %100, %cst_31 [1] : vector<4x128xi32> to vector<4xi32>
    %102 = vector.shape_cast %101 : vector<4xi32> to vector<4x1xi32>
    %103 = arith.cmpi eq, %91, %102 : vector<4x1xi32>
    %104 = arith.extui %103 : vector<4x1xi1> to vector<4x1xi32>
    %105 = arith.sitofp %104 : vector<4x1xi32> to vector<4x1xf32>
    %106 = vector.shape_cast %105 : vector<4x1xf32> to vector<1x4x1xf32>
    %cst_32 = arith.constant dense<0.000000e+00> : vector<1xf32>
    %107 = vector.multi_reduction <add>, %106, %cst_32 [1, 2] : vector<1x4x1xf32> to vector<1xf32>
    %108 = vector.shape_cast %107 : vector<1xf32> to vector<1x1x1xf32>
    %109 = vector.extract %108[0, 0, 0] : f32 from vector<1x1x1xf32>
    %110 = arith.addf %75, %109 : f32
    %c96_i32_33 = arith.constant 96 : i32
    %111 = vector.broadcast %c96_i32_33 : i32 to vector<4x128xi32>
    %112 = arith.cmpi sge, %5, %111 : vector<4x128xi32>
    %c128_i32_34 = arith.constant 128 : i32
    %113 = vector.broadcast %c128_i32_34 : i32 to vector<4x128xi32>
    %114 = arith.cmpi slt, %5, %113 : vector<4x128xi32>
    %115 = arith.andi %112, %114 : vector<4x128xi1>
    %cst_35 = arith.constant 0xFF800000 : f32
    %116 = vector.broadcast %cst_35 : f32 to vector<4x128xf32>
    %117 = arith.select %115, %3, %116 : vector<4x128xi1>, vector<4x128xf32>
    %cst_36 = arith.constant dense<0xFF800000> : vector<4xf32>
    %118 = vector.multi_reduction <maximumf>, %117, %cst_36 [1] : vector<4x128xf32> to vector<4xf32>
    %119 = vector.shape_cast %118 : vector<4xf32> to vector<4x1xf32>
    %120 = vector.broadcast %119 : vector<4x1xf32> to vector<4x128xf32>
    %121 = arith.cmpf oeq, %3, %120 : vector<4x128xf32>
    %122 = arith.andi %115, %121 : vector<4x128xi1>
    %c128_i32_37 = arith.constant 128 : i32
    %123 = vector.broadcast %c128_i32_37 : i32 to vector<4x128xi32>
    %124 = arith.select %122, %5, %123 : vector<4x128xi1>, vector<4x128xi32>
    %cst_38 = arith.constant dense<2147483647> : vector<4xi32>
    %125 = vector.multi_reduction <minsi>, %124, %cst_38 [1] : vector<4x128xi32> to vector<4xi32>
    %126 = vector.shape_cast %125 : vector<4xi32> to vector<4x1xi32>
    %cst_39 = arith.constant 0xFF800000 : f32
    %127 = vector.broadcast %cst_39 : f32 to vector<4x128xf32>
    %128 = arith.select %115, %4, %127 : vector<4x128xi1>, vector<4x128xf32>
    %cst_40 = arith.constant dense<0xFF800000> : vector<4xf32>
    %129 = vector.multi_reduction <maximumf>, %128, %cst_40 [1] : vector<4x128xf32> to vector<4xf32>
    %130 = vector.shape_cast %129 : vector<4xf32> to vector<4x1xf32>
    %131 = vector.broadcast %130 : vector<4x1xf32> to vector<4x128xf32>
    %132 = arith.cmpf oeq, %4, %131 : vector<4x128xf32>
    %133 = arith.andi %115, %132 : vector<4x128xi1>
    %c128_i32_41 = arith.constant 128 : i32
    %134 = vector.broadcast %c128_i32_41 : i32 to vector<4x128xi32>
    %135 = arith.select %133, %5, %134 : vector<4x128xi1>, vector<4x128xi32>
    %cst_42 = arith.constant dense<2147483647> : vector<4xi32>
    %136 = vector.multi_reduction <minsi>, %135, %cst_42 [1] : vector<4x128xi32> to vector<4xi32>
    %137 = vector.shape_cast %136 : vector<4xi32> to vector<4x1xi32>
    %138 = arith.cmpi eq, %126, %137 : vector<4x1xi32>
    %139 = arith.extui %138 : vector<4x1xi1> to vector<4x1xi32>
    %140 = arith.sitofp %139 : vector<4x1xi32> to vector<4x1xf32>
    %141 = vector.shape_cast %140 : vector<4x1xf32> to vector<1x4x1xf32>
    %cst_43 = arith.constant dense<0.000000e+00> : vector<1xf32>
    %142 = vector.multi_reduction <add>, %141, %cst_43 [1, 2] : vector<1x4x1xf32> to vector<1xf32>
    %143 = vector.shape_cast %142 : vector<1xf32> to vector<1x1x1xf32>
    %144 = vector.extract %143[0, 0, 0] : f32 from vector<1x1x1xf32>
    %145 = arith.addf %110, %144 : f32
    %c0_44 = arith.constant 0 : index
    %c0_45 = arith.constant 0 : index
    %c0_46 = arith.constant 0 : index
    %146 = vector.load %arg4[%c0_44, %c0_45, %c0_46] : memref<1x8x128xf32, #tpu.memory_space<vmem>>, vector<1x8x128xf32>
    %147 = vector.broadcast %145 : f32 to vector<1x8x128xf32>
    %148 = arith.addf %146, %147 : vector<1x8x128xf32>
    %c0_47 = arith.constant 0 : index
    %c0_48 = arith.constant 0 : index
    %c0_49 = arith.constant 0 : index
    %149 = vector.load %arg4[%c0_47, %c0_48, %c0_49] : memref<1x8x128xf32, #tpu.memory_space<vmem>>, vector<1x8x128xf32>
    tpu.vector_store %arg4[%c0_47, %c0_48, %c0_49], %148 {strides = array<i32>} : memref<1x8x128xf32, #tpu.memory_space<vmem>>, vector<1x8x128xf32>,
    return
  }
  func.func @transform_0(%arg0: i32, %arg1: i32) -> (i32, i32) {
    %c1_i32 = arith.constant 1 : i32
    %0 = arith.muli %arg0, %c1_i32 : i32
    %1 = arith.addi %0, %arg1 : i32
    %c0_i32 = arith.constant 0 : i32
    %c0_i32_0 = arith.constant 0 : i32
    return %1, %c0_i32 : i32, i32
  }
  func.func @transform_1(%arg0: i32, %arg1: i32) -> (i32, i32) {
    %c1_i32 = arith.constant 1 : i32
    %0 = arith.muli %arg0, %c1_i32 : i32
    %1 = arith.addi %0, %arg1 : i32
    %c0_i32 = arith.constant 0 : i32
    %c0_i32_0 = arith.constant 0 : i32
    return %1, %c0_i32 : i32, i32
  }
  func.func @transform_2(%arg0: i32, %arg1: i32) -> (i32, i32, i32) {
    %c0_i32 = arith.constant 0 : i32
    %c0_i32_0 = arith.constant 0 : i32
    %c0_i32_1 = arith.constant 0 : i32
    return %arg0, %c0_i32, %c0_i32_0 : i32, i32, i32
  }
}

</mosaic_0001>

<bundles_post_ra>
// kernel: tpu_custom_call.1
= control target key start
LH: loop header
LB: loop body
LE: loop exit
PB: predicated region body
PF: predicated region fallthrough
CT: control target
= control target key end

     0   :  { %7 = vsyncpa [#allocation3], 0  ;;  %s525_s0 = inlined_call_operand.hbm [shape: f32[4,128], index: 0, kind: input, shape index: {}]   ;;  %s526_s1 = inlined_call_operand.hbm [shape: f32[4,128], index: 1, kind: input, shape index: {}]   ;;  %s527_s2 = inlined_call_operand.hbm [shape: f32[1,8,128], index: 2, kind: output, shape index: {}]  }
   0x1   :  { %8 = vsyncpa [#allocation6], 0 }
   0x2   :  { %9 = vsyncpa [#allocation4], 0  ;;  %s401_s9 = smov [#allocation2]   ;;  %s402_s11 = smov [#allocation5]  }
   0x3   :  { %s19_s10 = sshll.u32 %s401_s9, 4  ;;  %s32_s12 = sshll.u32 %s402_s11, 4  ;;  %s20_s10 = int_to_ptr.vmem [resolvable:$true] %s19_s10  ;;  %s33_s12 = int_to_ptr.vmem [resolvable:$true] %s32_s12 }
   0x4   :  { %s343_s13 = scalar_lea.vmem %s20_s10, 64  ;;  %p348_p1 = scmp.lt.s32.totalorder %s20_s10, %s20_s10 }
   0x5   :  { %p344_p0 = scmp.ne.s32.totalorder %s20_s10, %s343_s13  ;;  %p349_p2 = scmp.lt.s32.totalorder %s343_s13, %s343_s13 }
   0x7   :  { %p350_p3 = por %p349_p2, %p348_p1 }
   0x9   :  { %p351_p4 = pnand %p350_p3, %p344_p0 }
   0xb   :  { %354 = shalt.err (!%p351_p4)
}
   0xc   :  { %22 = dma.hbm_to_vmem [thread:$0]  %s525_s0, 64, %s20_s10, [#allocation3]  }
   0xd   :  { %s363_s16 = scalar_lea.vmem %s33_s12, 64  ;;  %p368_p6 = scmp.lt.s32.totalorder %s33_s12, %s33_s12 }
   0xe   :  { %p364_p5 = scmp.ne.s32.totalorder %s33_s12, %s363_s16  ;;  %p369_p7 = scmp.lt.s32.totalorder %s363_s16, %s363_s16 }
  0x10   :  { %p370_p8 = por %p369_p7, %p368_p6 }
  0x12   :  { %p371_p9 = pnand %p370_p8, %p364_p5 }
  0x14   :  { %374 = shalt.err (!%p371_p9)
}
  0x15   :  { %35 = dma.hbm_to_vmem [thread:$0]  %s526_s1, 64, %s33_s12, [#allocation6]  }
  0x16   :  { %395 = dma.done.wait [#allocation3], 64  }
  0x17   :  { %396 = vsyncadd [#allocation3], 4294967232 }
  0x18   :  { %397 = dma.done.wait [#allocation6], 64  }
  0x19   :  { %398 = vsyncadd [#allocation6], 4294967232  ;;  %v51_v0 = vlaneseq  ;;  %vm57_vm4 = vcmask 1043456   ;;  %v437_v3 = vld [vmem:[#allocation2] sm:$0xf]  ;;  %s404_s24 = smov [#allocation7]  }
  0x1a   :  { %v439_v4 = vld [vmem:[#allocation5] sm:$0xf]  ;;  %s309_s25 = sshll.u32 %s404_s24, 4  ;;  %s310_s25 = int_to_ptr.vmem [resolvable:$true] %s309_s25 }
  0x1b   :  { %v426_v1 = vand.u32 127, %v51_v0  ;;  %s375_s26 = scalar_lea.vmem %s310_s25, 128  ;;  %p380_p11 = scmp.lt.s32.totalorder %s310_s25, %s310_s25 }
  0x1c   :  { %p376_p10 = scmp.ne.s32.totalorder %s310_s25, %s375_s26  ;;  %p381_p12 = scmp.lt.s32.totalorder %s375_s26, %s375_s26 }
  0x1d   :  { %vm116_vm0 = vcmp.ge.s32.totalorder %v426_v1, 32  ;;  %vm117_vm1 = vcmp.lt.s32.totalorder %v426_v1, 64  ;;  %vm54_vm2 = vcmp.lt.s32.totalorder %v426_v1, 32  ;;  %vm177_vm5 = vcmp.ge.s32.totalorder %v426_v1, 64 }
  0x1e   :  { %vm431_vm3 = vmand %vm116_vm0, %vm117_vm1  ;;  %vm178_vm6 = vcmp.lt.s32.totalorder %v426_v1, 96  ;;  %v56_v5 = vsel %vm54_vm2, %v437_v3, -inf  ;;  %v79_v7 = vsel %vm54_vm2, %v439_v4, -inf  ;;  %vm238_vm8 = vcmp.ge.s32.totalorder %v426_v1, 96  ;;  %p382_p13 = por %p381_p12, %p380_p11 }
  0x1f   :  { %v119_v6 = vsel %vm431_vm3, %v437_v3, -inf  ;;  %v141_v8 = vsel %vm431_vm3, %v439_v4, -inf  ;;  %v58_v9 = vsel %vm57_vm4, %v56_v5, -inf  ;;  %vm455_vm7 = vmand %vm177_vm5, %vm178_vm6  ;;  %v80_v12 = vsel %vm57_vm4, %v79_v7, -inf }
  0x20   :  { %v120_v10 = vsel %vm57_vm4, %v119_v6, -inf  ;;  %59 = vmax.xlane.f32.xlu0 %v58_v9  ;;  %v142_v13 = vsel %vm57_vm4, %v141_v8, -inf  ;;  %v180_v14 = vsel %vm455_vm7, %v437_v3, -inf  ;;  %v202_v15 = vsel %vm455_vm7, %v439_v4, -inf  ;;  %p383_p0 = pnand %p382_p13, %p376_p10 }
  0x21   :  { %121 = vmax.xlane.f32.xlu1 %v120_v10  ;;  %v181_v16 = vsel %vm57_vm4, %v180_v14, -inf  ;;  %v203_v17 = vsel %vm57_vm4, %v202_v15, -inf  ;;  %v241_v18 = vsel %vm238_vm8, %v437_v3, -inf  ;;  %v263_v19 = vsel %vm238_vm8, %v439_v4, -inf }
  0x22   :  { %v242_v20 = vsel %vm57_vm4, %v241_v18, -inf  ;;  %v264_v21 = vsel %vm57_vm4, %v263_v19, -inf }
  0x24   :  { %81 = vmax.xlane.f32.xlu0 %v80_v12 }
  0x25   :  { %143 = vmax.xlane.f32.xlu1 %v142_v13 }
  0x28   :  { %182 = vmax.xlane.f32.xlu0 %v181_v16 }
  0x29   :  { %204 = vmax.xlane.f32.xlu1 %v203_v17 }
  0x2c   :  { %243 = vmax.xlane.f32.xlu0 %v242_v20 }
  0x2d   :  { %265 = vmax.xlane.f32.xlu1 %v264_v21 }
  0xa9   :  { %v60_v22 = vpop.xlane.xlu0 %59 }
  0xaa   :  { %v122_v23 = vpop.xlane.xlu1 %121  ;;  %vm61_vm9 = vcmp.eq.f32.partialorder %v437_v3, %v60_v22 }
  0xab   :  { %vm123_vm10 = vcmp.eq.f32.partialorder %v437_v3, %v122_v23  ;;  %vm62_vm11 = vmand %vm54_vm2, %vm61_vm9 }
  0xac   :  { %v63_v24 = vsel %vm62_vm11, %v426_v1, 128  ;;  %vm124_vm12 = vmand %vm431_vm3, %vm123_vm10 }
  0xad   :  { %v125_v25 = vsel %vm124_vm12, %v426_v1, 128  ;;  %v82_v26 = vpop.xlane.xlu0 %81  ;;  %v64_v28 = vsel %vm57_vm4, %v63_v24, 2147483647 }
  0xae   :  { %v144_v27 = vpop.xlane.xlu1 %143  ;;  %vm83_vm13 = vcmp.eq.f32.partialorder %v439_v4, %v82_v26  ;;  %v66_v29 = vshra.s32 %v64_v28, 16  ;;  %v126_v30 = vsel %vm57_vm4, %v125_v25, 2147483647  ;;  %v65_v62 = vand.u32 65535, %v64_v28 }
  0xaf   :  { %vm145_vm14 = vcmp.eq.f32.partialorder %v439_v4, %v144_v27  ;;  %vm84_vm15 = vmand %vm54_vm2, %vm83_vm13  ;;  %v128_v31 = vshra.s32 %v126_v30, 16 }
  0xb0   :  { %v85_v32 = vsel %vm84_vm15, %v426_v1, 128  ;;  %vm146_vm0 = vmand %vm431_vm3, %vm145_vm14  ;;  %v68_v33 = vcvt.s32.f32 %v66_v29  ;;  %v67_v0 = vcvt.s32.f32 %v65_v62 }
  0xb1   :  { %v147_v34 = vsel %vm146_vm0, %v426_v1, 128  ;;  %v183_v35 = vpop.xlane.xlu0 %182  ;;  %v130_v37 = vcvt.s32.f32 %v128_v31  ;;  %v86_v38 = vsel %vm57_vm4, %v85_v32, 2147483647 }
  0xb2   :  { %v205_v36 = vpop.xlane.xlu1 %204  ;;  %vm184_vm1 = vcmp.eq.f32.partialorder %v437_v3, %v183_v35  ;;  %69 = vmin.xlane.f32.xlu0 %v68_v33  ;;  %v88_v39 = vshra.s32 %v86_v38, 16  ;;  %v148_v40 = vsel %vm57_vm4, %v147_v34, 2147483647  ;;  %v87_v2 = vand.u32 65535, %v86_v38 }
  0xb3   :  { %vm206_vm5 = vcmp.eq.f32.partialorder %v439_v4, %v205_v36  ;;  %vm185_vm2 = vmand %vm455_vm7, %vm184_vm1  ;;  %v150_v41 = vshra.s32 %v148_v40, 16  ;;  %v149_v8 = vand.u32 65535, %v148_v40  ;;  %vm104_vm1 = vcmask 3072  }
  0xb4   :  { %v186_v42 = vsel %vm185_vm2, %v426_v1, 128  ;;  %vm207_vm3 = vmand %vm455_vm7, %vm206_vm5  ;;  %v90_v43 = vcvt.s32.f32 %v88_v39  ;;  %v89_v6 = vcvt.s32.f32 %v87_v2 }
  0xb5   :  { %v208_v44 = vsel %vm207_vm3, %v426_v1, 128  ;;  %v244_v45 = vpop.xlane.xlu0 %243  ;;  %v152_v47 = vcvt.s32.f32 %v150_v41  ;;  %v187_v48 = vsel %vm57_vm4, %v186_v42, 2147483647  ;;  %v151_v14 = vcvt.s32.f32 %v149_v8 }
  0xb6   :  { %v266_v46 = vpop.xlane.xlu1 %265  ;;  %vm245_vm6 = vcmp.eq.f32.partialorder %v437_v3, %v244_v45  ;;  %131 = vmin.xlane.f32.xlu0 %v130_v37  ;;  %91 = vmin.xlane.f32.xlu1 %v90_v43  ;;  %v189_v49 = vshra.s32 %v187_v48, 16  ;;  %v209_v50 = vsel %vm57_vm4, %v208_v44, 2147483647  ;;  %v127_v3 = vand.u32 65535, %v126_v30 }
  0xb7   :  { %vm267_vm9 = vcmp.eq.f32.partialorder %v439_v4, %v266_v46  ;;  %vm246_vm7 = vmand %vm238_vm8, %vm245_vm6  ;;  %v211_v51 = vshra.s32 %v209_v50, 16  ;;  %v188_v9 = vand.u32 65535, %v187_v48  ;;  %v210_v16 = vand.u32 65535, %v209_v50 }
  0xb8   :  { %v247_v52 = vsel %vm246_vm7, %v426_v1, 128  ;;  %vm268_vm10 = vmand %vm238_vm8, %vm267_vm9  ;;  %v191_v53 = vcvt.s32.f32 %v189_v49  ;;  %v129_v7 = vcvt.s32.f32 %v127_v3 }
  0xb9   :  { %v269_v54 = vsel %vm268_vm10, %v426_v1, 128  ;;  %v248_v55 = vsel %vm57_vm4, %v247_v52, 2147483647  ;;  %v213_v56 = vcvt.s32.f32 %v211_v51  ;;  %v190_v15 = vcvt.s32.f32 %v188_v9 }
  0xba   :  { %153 = vmin.xlane.f32.xlu1 %v152_v47  ;;  %192 = vmin.xlane.f32.xlu0 %v191_v53  ;;  %v250_v57 = vshra.s32 %v248_v55, 16  ;;  %v270_v58 = vsel %vm57_vm4, %v269_v54, 2147483647  ;;  %v249_v17 = vand.u32 65535, %v248_v55  ;;  %v212_v22 = vcvt.s32.f32 %v210_v16 }
  0xbb   :  { %v272_v59 = vshra.s32 %v270_v58, 16  ;;  %v271_v24 = vand.u32 65535, %v270_v58  ;;  %v403_v51 = vmov 0.0  }
  0xbc   :  { %v252_v60 = vcvt.s32.f32 %v250_v57  ;;  %v251_v23 = vcvt.s32.f32 %v249_v17 }
  0xbd   :  { %v274_v61 = vcvt.s32.f32 %v272_v59  ;;  %v273_v28 = vcvt.s32.f32 %v271_v24 }
  0xbe   :  { %214 = vmin.xlane.f32.xlu1 %v213_v56  ;;  %253 = vmin.xlane.f32.xlu0 %v252_v60 }
  0xc2   :  { %275 = vmin.xlane.f32.xlu1 %v274_v61 }
 0x13b   :  { %v70_v63 = vpop.xlane.xlu0 %69 }
 0x13c   :  { %vm71_vm8 = vcmp.eq.f32.partialorder %v68_v33, %v70_v63  ;;  %v76_v31 = vcvt.f32.s32 %v70_v63 }
 0x13d   :  { %v72_v1 = vsel %vm71_vm8, %v67_v0, inf }
 0x13e   :  { %73 = vmin.xlane.f32.xlu0 %v72_v1 }
 0x13f   :  { %v92_v4 = vpop.xlane.xlu1 %91  ;;  %v132_v5 = vpop.xlane.xlu0 %131 }
 0x140   :  { %vm93_vm4 = vcmp.eq.f32.partialorder %v90_v43, %v92_v4  ;;  %vm133_vm11 = vcmp.eq.f32.partialorder %v130_v37, %v132_v5  ;;  %v98_v32 = vcvt.f32.s32 %v92_v4  ;;  %v138_v34 = vcvt.f32.s32 %v132_v5 }
 0x141   :  { %v94_v10 = vsel %vm93_vm4, %v89_v6, inf  ;;  %v134_v11 = vsel %vm133_vm11, %v129_v7, inf  ;;  %v77_v37 = vshll.u32 %v76_v31, 16 }
 0x142   :  { %95 = vmin.xlane.f32.xlu1 %v94_v10  ;;  %135 = vmin.xlane.f32.xlu0 %v134_v11  ;;  %v99_v38 = vshll.u32 %v98_v32, 16  ;;  %v139_v44 = vshll.u32 %v138_v34, 16 }
 0x143   :  { %v154_v12 = vpop.xlane.xlu1 %153  ;;  %v193_v13 = vpop.xlane.xlu0 %192 }
 0x144   :  { %vm155_vm12 = vcmp.eq.f32.partialorder %v152_v47, %v154_v12  ;;  %vm194_vm13 = vcmp.eq.f32.partialorder %v191_v53, %v193_v13  ;;  %v160_v39 = vcvt.f32.s32 %v154_v12  ;;  %v199_v45 = vcvt.f32.s32 %v193_v13 }
 0x145   :  { %v156_v18 = vsel %vm155_vm12, %v151_v14, inf  ;;  %v195_v19 = vsel %vm194_vm13, %v190_v15, inf }
 0x146   :  { %157 = vmin.xlane.f32.xlu1 %v156_v18  ;;  %196 = vmin.xlane.f32.xlu0 %v195_v19  ;;  %v161_v48 = vshll.u32 %v160_v39, 16  ;;  %v200_v57 = vshll.u32 %v199_v45, 16 }
 0x147   :  { %v215_v20 = vpop.xlane.xlu1 %214  ;;  %v254_v21 = vpop.xlane.xlu0 %253 }
 0x148   :  { %vm216_vm14 = vcmp.eq.f32.partialorder %v213_v56, %v215_v20  ;;  %vm255_vm15 = vcmp.eq.f32.partialorder %v252_v60, %v254_v21  ;;  %v221_v49 = vcvt.f32.s32 %v215_v20  ;;  %v260_v58 = vcvt.f32.s32 %v254_v21 }
 0x149   :  { %v217_v25 = vsel %vm216_vm14, %v212_v22, inf  ;;  %v256_v26 = vsel %vm255_vm15, %v251_v23, inf }
 0x14a   :  { %218 = vmin.xlane.f32.xlu1 %v217_v25  ;;  %257 = vmin.xlane.f32.xlu0 %v256_v26  ;;  %v261_v6 = vshll.u32 %v260_v58, 16 }
 0x14b   :  { %v276_v27 = vpop.xlane.xlu1 %275 }
 0x14c   :  { %vm277_vm0 = vcmp.eq.f32.partialorder %v274_v61, %v276_v27  ;;  %v222_v61 = vshll.u32 %v221_v49, 16  ;;  %v282_v62 = vcvt.f32.s32 %v276_v27 }
 0x14d   :  { %v278_v29 = vsel %vm277_vm0, %v273_v28, inf }
 0x14e   :  { %279 = vmin.xlane.f32.xlu1 %v278_v29  ;;  %v283_v7 = vshll.u32 %v282_v62, 16 }
 0x1c7   :  { %v74_v30 = vpop.xlane.xlu0 %73 }
 0x1c8   :  { %v75_v33 = vcvt.f32.s32 %v74_v30 }
 0x1ca   :  { %v78_v41 = vadd.s32 %v77_v37, %v75_v33 }
 0x1cb   :  { %v96_v35 = vpop.xlane.xlu1 %95  ;;  %v136_v36 = vpop.xlane.xlu0 %135 }
 0x1cc   :  { %v97_v40 = vcvt.f32.s32 %v96_v35  ;;  %v137_v43 = vcvt.f32.s32 %v136_v36 }
 0x1ce   :  { %v100_v42 = vadd.s32 %v99_v38, %v97_v40  ;;  %v140_v53 = vadd.s32 %v139_v44, %v137_v43 }
 0x1cf   :  { %v158_v46 = vpop.xlane.xlu1 %157  ;;  %v197_v47 = vpop.xlane.xlu0 %196 }
 0x1d0   :  { %v159_v50 = vcvt.f32.s32 %v158_v46  ;;  %vm101_vm5 = vcmp.eq.s32.totalorder %v78_v41, %v100_v42  ;;  %v198_v55 = vcvt.f32.s32 %v197_v47 }
 0x1d1   :  { %v319_v52 = vsel %vm101_vm5, 1.0, %v403_v51 }
 0x1d2   :  { %v162_v54 = vadd.s32 %v161_v48, %v159_v50  ;;  %v105_v56 = vsel %vm104_vm1, %v319_v52, 0.0  ;;  %v201_v2 = vadd.s32 %v200_v57, %v198_v55 }
 0x1d3   :  { %v219_v59 = vpop.xlane.xlu1 %218  ;;  %106 = vadd.xlane.f32.xlu0 %v105_v56  ;;  %v258_v60 = vpop.xlane.xlu0 %257 }
 0x1d4   :  { %v220_v63 = vcvt.f32.s32 %v219_v59  ;;  %vm163_vm2 = vcmp.eq.s32.totalorder %v140_v53, %v162_v54  ;;  %v259_v1 = vcvt.f32.s32 %v258_v60 }
 0x1d5   :  { %v320_v0 = vsel %vm163_vm2, 1.0, %v403_v51 }
 0x1d6   :  { %v223_v3 = vadd.s32 %v222_v61, %v220_v63  ;;  %v166_v4 = vsel %vm104_vm1, %v320_v0, 0.0  ;;  %v262_v10 = vadd.s32 %v261_v6, %v259_v1 }
 0x1d7   :  { %v280_v5 = vpop.xlane.xlu1 %279  ;;  %167 = vadd.xlane.f32.xlu1 %v166_v4 }
 0x1d8   :  { %v281_v8 = vcvt.f32.s32 %v280_v5  ;;  %vm224_vm3 = vcmp.eq.s32.totalorder %v201_v2, %v223_v3 }
 0x1d9   :  { %v321_v9 = vsel %vm224_vm3, 1.0, %v403_v51 }
 0x1da   :  { %v284_v11 = vadd.s32 %v283_v7, %v281_v8  ;;  %v227_v12 = vsel %vm104_vm1, %v321_v9, 0.0 }
 0x1db   :  { %228 = vadd.xlane.f32.xlu0 %v227_v12 }
 0x1dc   :  { %vm285_vm6 = vcmp.eq.s32.totalorder %v262_v10, %v284_v11 }
 0x1dd   :  { %v322_v13 = vsel %vm285_vm6, 1.0, %v403_v51 }
 0x1de   :  { %v288_v14 = vsel %vm104_vm1, %v322_v13, 0.0 }
 0x1df   :  { %289 = vadd.xlane.f32.xlu1 %v288_v14 }
 0x25c   :  { %v107_v15 = vpop.xlane.xlu0 %106 }
 0x25d   :  { %v108_v16 = vrot.slane %v107_v15, 4 }
 0x25f   :  { %v109_v17 = vadd.f32 %v108_v16, %v107_v15 }
 0x260   :  { %v168_v18 = vpop.xlane.xlu1 %167 }
 0x261   :  { %v110_v19 = vrot.slane %v109_v17, 2  ;;  %v169_v20 = vrot.slane %v168_v18, 4 }
 0x263   :  { %v170_v21 = vadd.f32 %v169_v20, %v168_v18  ;;  %v111_v22 = vadd.f32 %v110_v19, %v109_v17 }
 0x264   :  { %v229_v23 = vpop.xlane.xlu0 %228 }
 0x265   :  { %v171_v24 = vrot.slane %v170_v21, 2  ;;  %v230_v25 = vrot.slane %v229_v23, 4  ;;  %v112_v26 = vrot.slane %v111_v22, 1 }
 0x267   :  { %v231_v27 = vadd.f32 %v230_v25, %v229_v23  ;;  %v113_v28 = vadd.f32 %v112_v26, %v111_v22  ;;  %v172_v29 = vadd.f32 %v171_v24, %v170_v21 }
 0x268   :  { %v290_v30 = vpop.xlane.xlu1 %289 }
 0x269   :  { %v232_v31 = vrot.slane %v231_v27, 2  ;;  %v291_v32 = vrot.slane %v290_v30, 4  ;;  %323 = vpush %v113_v28  ;;  %v173_v33 = vrot.slane %v172_v29, 1 }
 0x26b   :  { %v233_v34 = vadd.f32 %v232_v31, %v231_v27  ;;  %v292_v35 = vadd.f32 %v291_v32, %v290_v30  ;;  %v174_v36 = vadd.f32 %v173_v33, %v172_v29 }
 0x26d   :  { %v293_v37 = vrot.slane %v292_v35, 2  ;;  %325 = vpush %v174_v36  ;;  %v234_v38 = vrot.slane %v233_v34, 1 }
 0x26f   :  { %v294_v39 = vadd.f32 %v293_v37, %v292_v35  ;;  %v235_v40 = vadd.f32 %v234_v38, %v233_v34 }
 0x271   :  { %327 = vpush %v235_v40  ;;  %v295_v41 = vrot.slane %v294_v39, 1 }
 0x273   :  { %v296_v42 = vadd.f32 %v295_v41, %v294_v39 }
 0x275   :  { %329 = vpush %v296_v42 }
 0x29a   :  { %s324_s0 = spop %323 }
 0x29e   :  { %s326_s1 = spop %325 }
 0x29f   :  { %s176_s20 = sadd.f32 %s326_s1, %s324_s0 }
 0x2a2   :  { %s328_s19 = spop %327 }
 0x2a3   :  { %s237_s21 = sadd.f32 %s328_s19, %s176_s20 }
 0x2a6   :  { %s330_s22 = spop %329 }
 0x2a7   :  { %s298_s23 = sadd.f32 %s330_s22, %s237_s21 }
 0x2a9   :  { %v300_v43 = vstv %s298_s23 }
 0x2aa   :  { %302 = vst [vmem:[#allocation7] sm:$0xff] %v300_v43 }
 0x2ab   :  { %386 = shalt.err (!%p383_p0)
}
 0x2ac   :  { %312 = dma.vmem_to_hbm [thread:$0]  %s310_s25, 128, %s527_s2, [#allocation4]  }
 0x2ad   :  { %399 = dma.done.wait [#allocation4], 128  }
 0x2ae   :  { %400 = vsyncadd [#allocation4], 4294967168 }
 0x2af   :  { %316 = vsyncpa [#allocation3], 1 }
 0x2b0   :  { %317 = vsyncpa [#allocation6], 1 }
 0x2b1   :  { %318 = vsyncpa [#allocation4], 1 }

</bundles_post_ra>
